<compile_context>
chip_gen: v7x
topology: tpu7x:2x2x1
jax: 0.10.0
libtpu: 0.0.40
codegen_flags: <defaults>
</compile_context>

<pallas_src>
import functools

import jax
import jax.numpy as jnp
from jax import lax
from jax.experimental import pallas as pl
from jax.experimental.pallas import tpu as pltpu


_NEG_INF = -1e30  # finite mask value (avoids inf-inf NaN hazards under tiling)


def _layernorm(x, g, b, eps=1e-5):
    # x: (rows, C) f32; g/b: (1, C) f32.  PyTorch LayerNorm (biased variance).
    m = jnp.mean(x, axis=-1, keepdims=True)
    v = jnp.mean((x - m) ** 2, axis=-1, keepdims=True)
    return (x - m) * lax.rsqrt(v + eps) * g + b


# -----------------------------------------------------------------------------
# Pass 1: LN1 + fused full-width QKV projection (scale pre-folded into Q cols).
# -----------------------------------------------------------------------------
def qkv_kernel(x_ref, g_ref, b_ref, wqkv_ref, q_ref, k_ref, v_ref, *, matmul_dtype):
    x = x_ref[...].astype(jnp.float32)                       # (tq, C)
    C = x.shape[-1]
    x1 = _layernorm(x, g_ref[...], b_ref[...]).astype(matmul_dtype)
    qkv = jnp.dot(x1, wqkv_ref[...],
                  preferred_element_type=jnp.float32)        # (tq, 3C), f32 acc
    # Split and cast once; the f32 qkv result dies immediately.
    q_ref[...] = qkv[:, :C].astype(q_ref.dtype)
    k_ref[...] = qkv[:, C:2 * C].astype(k_ref.dtype)
    v_ref[...] = qkv[:, 2 * C:].astype(v_ref.dtype)


# -----------------------------------------------------------------------------
# Pass 2: causal attention (online softmax over kv blocks) + output projection
#         + residual + LN2 + FFN, one query chunk per grid step.
# -----------------------------------------------------------------------------
def attn_ffn_kernel(
    x_ref, q_ref, k_ref, v_ref,
    wproj_ref, bproj_ref, ln2_g_ref, ln2_b_ref,
    w1_ref, b1_ref, w2_ref, b2_ref,
    o_ref,
    m_scr, l_scr, acc_scr,
    *, n_head, tq, tk, matmul_dtype, approx_recip,
):
    mm = matmul_dtype
    T, C = k_ref.shape
    hs = C // n_head
    c = pl.program_id(1)                                     # query-chunk index

    q = q_ref[...]                                           # (tq, C), mm, pre-scaled
    x_res = x_ref[...].astype(jnp.float32)                   # (tq, C)

    # Online-softmax state (re-initialised every grid step).
    m_scr[...] = jnp.full((tq, n_head), _NEG_INF, jnp.float32)
    l_scr[...] = jnp.zeros((tq, n_head), jnp.float32)
    acc_scr[...] = jnp.zeros((tq, C), jnp.float32)

    row = c * tq + lax.broadcasted_iota(jnp.int32, (tq, tk), 0)
    col_local = lax.broadcasted_iota(jnp.int32, (tq, tk), 1)

    def kv_step(j, carry):
        start = pl.multiple_of(j * tk, tk)
        k_blk = k_ref[pl.ds(start, tk), :]                   # (tk, C), mm
        v_blk = v_ref[pl.ds(start, tk), :]
        # Causal bias only for this (tq, tk) block (all-zero for j < c).
        bias = jnp.where((j * tk + col_local) <= row, 0.0, _NEG_INF)
        # TODO(synk): for head_size not a multiple of 128, pad hs to 128 in the
        # QKV layout so per-head lane slices are 128-aligned on v6e/v7x.
        for h in range(n_head):                              # static, n_head small
            sl = slice(h * hs, (h + 1) * hs)
            # q_h @ k_h^T without materializing a transpose of k.
            s = lax.dot_general(q[:, sl], k_blk[:, sl],
                                (((1,), (1,)), ((), ())),
                                preferred_element_type=jnp.float32) + bias
            m_prev = m_scr[:, h:h + 1]
            m_new = jnp.maximum(m_prev, jnp.max(s, axis=-1, keepdims=True))
            alpha = jnp.exp(m_prev - m_new)
            p = jnp.exp(s - m_new)
            l_scr[:, h:h + 1] = alpha * l_scr[:, h:h + 1] + jnp.sum(
                p, axis=-1, keepdims=True)
            acc_scr[:, sl] = alpha * acc_scr[:, sl] + jnp.dot(
                p.astype(mm), v_blk[:, sl], preferred_element_type=jnp.float32)
            m_scr[:, h:h + 1] = m_new
        return carry

    # Only kv blocks 0..c are touched (causality): ~2x less attention work.
    lax.fori_loop(0, c + 1, kv_step, 0)

    # Per-head normalization, then ONE full-K projection GEMM.
    l_all = l_scr[...]                                       # (tq, n_head)
    if approx_recip:
        inv_l = pl.reciprocal(l_all, approx=True)            # EUP slot, ~free
    else:
        inv_l = 1.0 / l_all                                  # exact path (checks)
    for h in range(n_head):
        sl = slice(h * hs, (h + 1) * hs)
        acc_scr[:, sl] = acc_scr[:, sl] * inv_l[:, h:h + 1]

    sa = jnp.dot(acc_scr[...].astype(mm), wproj_ref[...],
                 preferred_element_type=jnp.float32) + bproj_ref[...]
    x2 = x_res + sa                                          # attention residual

    # ---- feed-forward branch -------------------------------------------------
    # TODO(synk): for C >= 2048 stream w1/w2 in column/row blocks instead of
    # holding them resident (needed to fit v7x's 64 MiB VMEM).
    x2n = _layernorm(x2, ln2_g_ref[...], ln2_b_ref[...])
    h1 = jnp.dot(x2n.astype(mm), w1_ref[...],
                 preferred_element_type=jnp.float32) + b1_ref[...]
    h1 = jnp.maximum(h1, 0.0)                                # ReLU (f32)
    ff = jnp.dot(h1.astype(mm), w2_ref[...],
                 preferred_element_type=jnp.float32) + b2_ref[...]

    o_ref[...] = (x2 + ff).astype(o_ref.dtype)


# -----------------------------------------------------------------------------
# Wrapper
# -----------------------------------------------------------------------------
def _pick_chunk(T, target=256):
    """Largest divisor of T that is <= target and a multiple of 8 (or T)."""
    for d in range(min(T, target), 0, -1):
        if T % d == 0 and (d % 8 == 0 or d == T):
            return d
    return T


def _vmem_limit_bytes():
    try:
        kind = jax.devices()[0].device_kind.lower()
    except Exception:
        return None
    if "v7" in kind or "7x" in kind:
        return 56 << 20          # leave headroom under v7x's 64 MiB
    if "v6" in kind or "v5e" in kind or "v5 lite" in kind or "v5p" in kind:
        return 100 << 20
    return None                  # unknown generation: keep compiler default


def _const_index_map(nd):
    return lambda *_: (0,) * nd


def _block_forward_impl(x, params, n_head, *, matmul_dtype, single_buffer_weights):
    B, T, C = x.shape
    assert C % n_head == 0
    mm = matmul_dtype
    tq = _pick_chunk(T)
    nc = T // tq

    cparams = pltpu.CompilerParams(
        dimension_semantics=("parallel", "parallel"),
        vmem_limit_bytes=_vmem_limit_bytes())

    def const_spec(a):
        # Weights/LN params stay resident; single-buffering halves their VMEM.
        kw = {"pipeline_mode": pl.Buffered(1)} if single_buffer_weights else {}
        return pl.BlockSpec(a.shape, _const_index_map(a.ndim), **kw)

    row_spec = pl.BlockSpec((None, tq, C), lambda b, c: (b, c, 0))
    full_seq_spec = pl.BlockSpec((None, T, C), lambda b, c: (b, 0, 0))

    # ---- pass 1: LN1 + fused QKV GEMM (attention scale folded into Q cols) ---
    scale = C ** (-0.5)  # NOTE: PyTorch code scales by n_embd, not head_size.
    wqkv = jnp.concatenate(
        [params["wq"] * scale, params["wk"], params["wv"]], axis=1).astype(mm)
    qkv_params = [params["ln1_g"], params["ln1_b"], wqkv]

    q, k, v = pl.pallas_call(
        functools.partial(qkv_kernel, matmul_dtype=mm),
        out_shape=[jax.ShapeDtypeStruct((B, T, C), mm)] * 3,
        grid=(B, nc),
        in_specs=[row_spec] + [const_spec(p) for p in qkv_params],
        out_specs=[row_spec] * 3,
        compiler_params=cparams,
    )(x, *qkv_params)

    # ---- pass 2: attention + projection + residual + LN2 + FFN ---------------
    attn_params = [
        params["wproj"].astype(mm), params["bproj"],
        params["ln2_g"], params["ln2_b"],
        params["w1"].astype(mm), params["b1"],
        params["w2"].astype(mm), params["b2"],
    ]
    kernel = functools.partial(
        attn_ffn_kernel, n_head=n_head, tq=tq, tk=tq, matmul_dtype=mm,
        approx_recip=(jnp.dtype(mm) != jnp.dtype(jnp.float32)))

    return pl.pallas_call(
        kernel,
        out_shape=jax.ShapeDtypeStruct((B, T, C), x.dtype),
        grid=(B, nc),
        in_specs=[row_spec, row_spec, full_seq_spec, full_seq_spec]
        + [const_spec(p) for p in attn_params],
        out_specs=row_spec,
        scratch_shapes=[
            pltpu.VMEM((tq, n_head), jnp.float32),   # running max (per head)
            pltpu.VMEM((tq, n_head), jnp.float32),   # running sum (per head)
            pltpu.VMEM((tq, C), jnp.float32),        # unnormalized head outputs
        ],
        compiler_params=cparams,
    )(x, q, k, v, *attn_params)


def block_forward(x, params, n_head, *, matmul_dtype=jnp.bfloat16):
    """Fused transformer-block forward.  x: (B, T, C) float32."""
    try:
        return _block_forward_impl(
            x, params, n_head, matmul_dtype=matmul_dtype,
            single_buffer_weights=True)
    except Exception:
        # Fallback for jax builds that reject pipeline_mode=pl.Buffered(1).
        return _block_forward_impl(
            x, params, n_head, matmul_dtype=matmul_dtype,
            single_buffer_weights=False)


# ---- pure-JAX reference (for correctness check) ------------------------------
def block_reference(x, p, n_head):
    def ln(y, g, b, eps=1e-5):
        m = y.mean(-1, keepdims=True)
        v = ((y - m) ** 2).mean(-1, keepdims=True)
        return (y - m) / jnp.sqrt(v + eps) * g + b

    B, T, C = x.shape
    hs = C // n_head
    x1 = ln(x, p["ln1_g"], p["ln1_b"])
    q = x1 @ p["wq"]
    k = x1 @ p["wk"]
    v = x1 @ p["wv"]
    q = q.reshape(B, T, n_head, hs).transpose(0, 2, 1, 3)
    k = k.reshape(B, T, n_head, hs).transpose(0, 2, 1, 3)
    v = v.reshape(B, T, n_head, hs).transpose(0, 2, 1, 3)
    wei = jnp.einsum("bhqd,bhkd->bhqk", q, k) * (C ** -0.5)
    mask = jnp.tril(jnp.ones((T, T), bool))
    wei = jnp.where(mask, wei, -jnp.inf)
    wei = jax.nn.softmax(wei, axis=-1)
    sa = jnp.einsum("bhqk,bhkd->bhqd", wei, v).transpose(0, 2, 1, 3).reshape(B, T, C)
    sa = sa @ p["wproj"] + p["bproj"]
    x2 = x + sa
    x2n = ln(x2, p["ln2_g"], p["ln2_b"])
    ff = jnp.maximum(x2n @ p["w1"] + p["b1"], 0.0) @ p["w2"] + p["b2"]
    return x2 + ff


def make_params(key, n_embd):
    C = n_embd
    ks = jax.random.split(key, 8)
    scale_c = 1.0 / jnp.sqrt(C)
    scale_4c = 1.0 / jnp.sqrt(4 * C)
    u = lambda k, shp, s: jax.random.uniform(k, shp, jnp.float32, -s, s)
    return {
        "ln1_g": jnp.ones((1, C), jnp.float32),
        "ln1_b": jnp.zeros((1, C), jnp.float32),
        "wq": u(ks[0], (C, C), scale_c),
        "wk": u(ks[1], (C, C), scale_c),
        "wv": u(ks[2], (C, C), scale_c),
        "wproj": u(ks[3], (C, C), scale_c),
        "bproj": u(ks[4], (1, C), scale_c),
        "ln2_g": jnp.ones((1, C), jnp.float32),
        "ln2_b": jnp.zeros((1, C), jnp.float32),
        "w1": u(ks[5], (C, 4 * C), scale_c),
        "b1": jnp.zeros((1, 4 * C), jnp.float32),
        "w2": u(ks[6], (4 * C, C), scale_4c),
        "b2": jnp.zeros((1, C), jnp.float32),
    }


if __name__ == "__main__":
    B, T, n_embd, n_head = 2, 8, 32, 4   # block_size == T
    key = jax.random.PRNGKey(0)
    kx, kp = jax.random.split(key)
    x = jax.random.normal(kx, (B, T, n_embd), jnp.float32)
    params = make_params(kp, n_embd)

    ref = block_reference(x, params, n_head)

    # Exact-arithmetic path (f32 MXU operands) — tight check vs reference.
    out_f32 = jax.block_until_ready(
        block_forward(x, params, n_head, matmul_dtype=jnp.float32))
    assert jnp.allclose(out_f32, ref, atol=1e-4, rtol=1e-4), (
        f"f32 path max abs err {jnp.max(jnp.abs(out_f32 - ref))}")

    # Optimized path: bf16 MXU operands, f32 accumulation, approx reciprocal.
    out_bf16 = jax.block_until_ready(
        block_forward(x, params, n_head, matmul_dtype=jnp.bfloat16))
    assert jnp.allclose(out_bf16, ref, atol=5e-2, rtol=5e-2), (
        f"bf16 path max abs err {jnp.max(jnp.abs(out_bf16 - ref))}")

    print("KERNEL_OK")
</pallas_src>

<mosaic_0001>
module attributes {stable_mosaic.version = 11 : i64} {
  func.func @qkv_kernel(%arg0: i32, %arg1: i32, %arg2: memref<1x8x32xf32, #tpu.memory_space<vmem>>, %arg3: memref<1x32xf32, #tpu.memory_space<vmem>>, %arg4: memref<1x32xf32, #tpu.memory_space<vmem>>, %arg5: memref<32x96xf32, #tpu.memory_space<vmem>>, %arg6: memref<1x8x32xf32, #tpu.memory_space<vmem>>, %arg7: memref<1x8x32xf32, #tpu.memory_space<vmem>>, %arg8: memref<1x8x32xf32, #tpu.memory_space<vmem>>) attributes {dimension_semantics = [#tpu.dimension_semantics<parallel>, #tpu.dimension_semantics<parallel>], iteration_bounds = array<i64: 2, 1>, scalar_prefetch = 0 : i64, scratch_operands = 0 : i64, tpu.core_type = #tpu.core_type<tc>, window_params = [{transform_indices = @transform_0, window_bounds = array<i64: 1, 8, 32>}, {pipeline_mode = #tpu.pipeline_mode<synchronous>, transform_indices = @transform_1, window_bounds = array<i64: 1, 32>}, {pipeline_mode = #tpu.pipeline_mode<synchronous>, transform_indices = @transform_2, window_bounds = array<i64: 1, 32>}, {pipeline_mode = #tpu.pipeline_mode<synchronous>, transform_indices = @transform_3, window_bounds = array<i64: 32, 96>}, {transform_indices = @transform_4, window_bounds = array<i64: 1, 8, 32>}, {transform_indices = @transform_5, window_bounds = array<i64: 1, 8, 32>}, {transform_indices = @transform_6, window_bounds = array<i64: 1, 8, 32>}]} {
    %c0 = arith.constant 0 : index
    %c0_0 = arith.constant 0 : index
    %c0_1 = arith.constant 0 : index
    %0 = vector.load %arg2[%c0, %c0_0, %c0_1] : memref<1x8x32xf32, #tpu.memory_space<vmem>>, vector<1x8x32xf32>
    %1 = vector.shape_cast %0 : vector<1x8x32xf32> to vector<8x32xf32>
    %c0_2 = arith.constant 0 : index
    %c0_3 = arith.constant 0 : index
    %2 = vector.load %arg3[%c0_2, %c0_3] : memref<1x32xf32, #tpu.memory_space<vmem>>, vector<1x32xf32>
    %c0_4 = arith.constant 0 : index
    %c0_5 = arith.constant 0 : index
    %3 = vector.load %arg4[%c0_4, %c0_5] : memref<1x32xf32, #tpu.memory_space<vmem>>, vector<1x32xf32>
    %cst = arith.constant dense<0.000000e+00> : vector<8xf32>
    %4 = vector.multi_reduction <add>, %1, %cst [1] : vector<8x32xf32> to vector<8xf32>
    %5 = vector.shape_cast %4 : vector<8xf32> to vector<8x1xf32>
    %cst_6 = arith.constant 3.200000e+01 : f32
    %6 = vector.broadcast %cst_6 : f32 to vector<8x1xf32>
    %7 = arith.divf %5, %6 : vector<8x1xf32>
    %8 = vector.broadcast %7 : vector<8x1xf32> to vector<8x32xf32>
    %9 = arith.subf %1, %8 : vector<8x32xf32>
    %10 = arith.mulf %9, %9 : vector<8x32xf32>
    %cst_7 = arith.constant dense<0.000000e+00> : vector<8xf32>
    %11 = vector.multi_reduction <add>, %10, %cst_7 [1] : vector<8x32xf32> to vector<8xf32>
    %12 = vector.shape_cast %11 : vector<8xf32> to vector<8x1xf32>
    %cst_8 = arith.constant 3.200000e+01 : f32
    %13 = vector.broadcast %cst_8 : f32 to vector<8x1xf32>
    %14 = arith.divf %12, %13 : vector<8x1xf32>
    %15 = vector.broadcast %7 : vector<8x1xf32> to vector<8x32xf32>
    %16 = arith.subf %1, %15 : vector<8x32xf32>
    %cst_9 = arith.constant 9.99999974E-6 : f32
    %17 = vector.broadcast %cst_9 : f32 to vector<8x1xf32>
    %18 = arith.addf %14, %17 : vector<8x1xf32>
    %19 = math.rsqrt %18 : vector<8x1xf32>
    %20 = vector.broadcast %19 : vector<8x1xf32> to vector<8x32xf32>
    %21 = arith.mulf %16, %20 : vector<8x32xf32>
    %22 = vector.broadcast %2 : vector<1x32xf32> to vector<8x32xf32>
    %23 = arith.mulf %21, %22 : vector<8x32xf32>
    %24 = vector.broadcast %3 : vector<1x32xf32> to vector<8x32xf32>
    %25 = arith.addf %23, %24 : vector<8x32xf32>
    %c0_10 = arith.constant 0 : index
    %c0_11 = arith.constant 0 : index
    %26 = vector.load %arg5[%c0_10, %c0_11] : memref<32x96xf32, #tpu.memory_space<vmem>>, vector<32x96xf32>
    %cst_12 = arith.constant dense<0.000000e+00> : vector<8x96xf32>
    %27 = tpu.matmul %25, %26, %cst_12 {dimension_numbers = #tpu.dot_dimension_numbers<[1], [0], [0], [1], [0, 0, 1, 1], [], []>} : vector<8x32xf32>, vector<32x96xf32>, vector<8x96xf32> -> vector<8x96xf32>
    %28 = vector.extract_strided_slice %27 {offsets = [0, 0], sizes = [8, 32], strides = [1, 1]} : vector<8x96xf32> to vector<8x32xf32>
    %c0_13 = arith.constant 0 : index
    %c0_14 = arith.constant 0 : index
    %c0_15 = arith.constant 0 : index
    %29 = vector.load %arg6[%c0_13, %c0_14, %c0_15] : memref<1x8x32xf32, #tpu.memory_space<vmem>>, vector<1x8x32xf32>
    %30 = vector.shape_cast %29 : vector<1x8x32xf32> to vector<8x32xf32>
    %31 = vector.shape_cast %28 : vector<8x32xf32> to vector<1x8x32xf32>
    tpu.vector_store %arg6[%c0_13, %c0_14, %c0_15], %31 {strides = array<i32>} : memref<1x8x32xf32, #tpu.memory_space<vmem>>, vector<1x8x32xf32>,
    %32 = vector.extract_strided_slice %27 {offsets = [0, 32], sizes = [8, 32], strides = [1, 1]} : vector<8x96xf32> to vector<8x32xf32>
    %c0_16 = arith.constant 0 : index
    %c0_17 = arith.constant 0 : index
    %c0_18 = arith.constant 0 : index
    %33 = vector.load %arg7[%c0_16, %c0_17, %c0_18] : memref<1x8x32xf32, #tpu.memory_space<vmem>>, vector<1x8x32xf32>
    %34 = vector.shape_cast %33 : vector<1x8x32xf32> to vector<8x32xf32>
    %35 = vector.shape_cast %32 : vector<8x32xf32> to vector<1x8x32xf32>
    tpu.vector_store %arg7[%c0_16, %c0_17, %c0_18], %35 {strides = array<i32>} : memref<1x8x32xf32, #tpu.memory_space<vmem>>, vector<1x8x32xf32>,
    %36 = vector.extract_strided_slice %27 {offsets = [0, 64], sizes = [8, 32], strides = [1, 1]} : vector<8x96xf32> to vector<8x32xf32>
    %c0_19 = arith.constant 0 : index
    %c0_20 = arith.constant 0 : index
    %c0_21 = arith.constant 0 : index
    %37 = vector.load %arg8[%c0_19, %c0_20, %c0_21] : memref<1x8x32xf32, #tpu.memory_space<vmem>>, vector<1x8x32xf32>
    %38 = vector.shape_cast %37 : vector<1x8x32xf32> to vector<8x32xf32>
    %39 = vector.shape_cast %36 : vector<8x32xf32> to vector<1x8x32xf32>
    tpu.vector_store %arg8[%c0_19, %c0_20, %c0_21], %39 {strides = array<i32>} : memref<1x8x32xf32, #tpu.memory_space<vmem>>, vector<1x8x32xf32>,
    return
  }
  func.func @transform_0(%arg0: i32, %arg1: i32) -> (i32, i32, i32) {
    %c0_i32 = arith.constant 0 : i32
    %c0_i32_0 = arith.constant 0 : i32
    return %arg0, %arg1, %c0_i32 : i32, i32, i32
  }
  func.func @transform_1(%arg0: i32, %arg1: i32) -> (i32, i32) {
    %c0_i32 = arith.constant 0 : i32
    %c0_i32_0 = arith.constant 0 : i32
    %c0_i32_1 = arith.constant 0 : i32
    return %c0_i32, %c0_i32_0 : i32, i32
  }
  func.func @transform_2(%arg0: i32, %arg1: i32) -> (i32, i32) {
    %c0_i32 = arith.constant 0 : i32
    %c0_i32_0 = arith.constant 0 : i32
    %c0_i32_1 = arith.constant 0 : i32
    return %c0_i32, %c0_i32_0 : i32, i32
  }
  func.func @transform_3(%arg0: i32, %arg1: i32) -> (i32, i32) {
    %c0_i32 = arith.constant 0 : i32
    %c0_i32_0 = arith.constant 0 : i32
    %c0_i32_1 = arith.constant 0 : i32
    return %c0_i32, %c0_i32_0 : i32, i32
  }
  func.func @transform_4(%arg0: i32, %arg1: i32) -> (i32, i32, i32) {
    %c0_i32 = arith.constant 0 : i32
    %c0_i32_0 = arith.constant 0 : i32
    return %arg0, %arg1, %c0_i32 : i32, i32, i32
  }
  func.func @transform_5(%arg0: i32, %arg1: i32) -> (i32, i32, i32) {
    %c0_i32 = arith.constant 0 : i32
    %c0_i32_0 = arith.constant 0 : i32
    return %arg0, %arg1, %c0_i32 : i32, i32, i32
  }
  func.func @transform_6(%arg0: i32, %arg1: i32) -> (i32, i32, i32) {
    %c0_i32 = arith.constant 0 : i32
    %c0_i32_0 = arith.constant 0 : i32
    return %arg0, %arg1, %c0_i32 : i32, i32, i32
  }
}

module attributes {stable_mosaic.version = 11 : i64} {
  func.func @qkv_kernel(%arg0: i32, %arg1: i32, %arg2: memref<1x8x32xf32, #tpu.memory_space<vmem>>, %arg3: memref<1x32xf32, #tpu.memory_space<vmem>>, %arg4: memref<1x32xf32, #tpu.memory_space<vmem>>, %arg5: memref<32x96xf32, #tpu.memory_space<vmem>>, %arg6: memref<1x8x32xf32, #tpu.memory_space<vmem>>, %arg7: memref<1x8x32xf32, #tpu.memory_space<vmem>>, %arg8: memref<1x8x32xf32, #tpu.memory_space<vmem>>) attributes {dimension_semantics = [#tpu.dimension_semantics<parallel>, #tpu.dimension_semantics<parallel>], iteration_bounds = array<i64: 2, 1>, scalar_prefetch = 0 : i64, scratch_operands = 0 : i64, tpu.core_type = #tpu.core_type<tc>, window_params = [{transform_indices = @transform_0, window_bounds = array<i64: 1, 8, 32>}, {pipeline_mode = #tpu.pipeline_mode<synchronous>, transform_indices = @transform_1, window_bounds = array<i64: 1, 32>}, {pipeline_mode = #tpu.pipeline_mode<synchronous>, transform_indices = @transform_2, window_bounds = array<i64: 1, 32>}, {pipeline_mode = #tpu.pipeline_mode<synchronous>, transform_indices = @transform_3, window_bounds = array<i64: 32, 96>}, {transform_indices = @transform_4, window_bounds = array<i64: 1, 8, 32>}, {transform_indices = @transform_5, window_bounds = array<i64: 1, 8, 32>}, {transform_indices = @transform_6, window_bounds = array<i64: 1, 8, 32>}]} {
    %c0 = arith.constant 0 : index
    %c0_0 = arith.constant 0 : index
    %c0_1 = arith.constant 0 : index
    %0 = vector.load %arg2[%c0, %c0_0, %c0_1] : memref<1x8x32xf32, #tpu.memory_space<vmem>>, vector<1x8x32xf32>
    %1 = vector.shape_cast %0 : vector<1x8x32xf32> to vector<8x32xf32>
    %c0_2 = arith.constant 0 : index
    %c0_3 = arith.constant 0 : index
    %2 = vector.load %arg3[%c0_2, %c0_3] : memref<1x32xf32, #tpu.memory_space<vmem>>, vector<1x32xf32>
    %c0_4 = arith.constant 0 : index
    %c0_5 = arith.constant 0 : index
    %3 = vector.load %arg4[%c0_4, %c0_5] : memref<1x32xf32, #tpu.memory_space<vmem>>, vector<1x32xf32>
    %cst = arith.constant dense<0.000000e+00> : vector<8xf32>
    %4 = vector.multi_reduction <add>, %1, %cst [1] : vector<8x32xf32> to vector<8xf32>
    %5 = vector.shape_cast %4 : vector<8xf32> to vector<8x1xf32>
    %cst_6 = arith.constant 3.200000e+01 : f32
    %6 = vector.broadcast %cst_6 : f32 to vector<8x1xf32>
    %7 = arith.divf %5, %6 : vector<8x1xf32>
    %8 = vector.broadcast %7 : vector<8x1xf32> to vector<8x32xf32>
    %9 = arith.subf %1, %8 : vector<8x32xf32>
    %10 = arith.mulf %9, %9 : vector<8x32xf32>
    %cst_7 = arith.constant dense<0.000000e+00> : vector<8xf32>
    %11 = vector.multi_reduction <add>, %10, %cst_7 [1] : vector<8x32xf32> to vector<8xf32>
    %12 = vector.shape_cast %11 : vector<8xf32> to vector<8x1xf32>
    %cst_8 = arith.constant 3.200000e+01 : f32
    %13 = vector.broadcast %cst_8 : f32 to vector<8x1xf32>
    %14 = arith.divf %12, %13 : vector<8x1xf32>
    %15 = vector.broadcast %7 : vector<8x1xf32> to vector<8x32xf32>
    %16 = arith.subf %1, %15 : vector<8x32xf32>
    %cst_9 = arith.constant 9.99999974E-6 : f32
    %17 = vector.broadcast %cst_9 : f32 to vector<8x1xf32>
    %18 = arith.addf %14, %17 : vector<8x1xf32>
    %19 = math.rsqrt %18 : vector<8x1xf32>
    %20 = vector.broadcast %19 : vector<8x1xf32> to vector<8x32xf32>
    %21 = arith.mulf %16, %20 : vector<8x32xf32>
    %22 = vector.broadcast %2 : vector<1x32xf32> to vector<8x32xf32>
    %23 = arith.mulf %21, %22 : vector<8x32xf32>
    %24 = vector.broadcast %3 : vector<1x32xf32> to vector<8x32xf32>
    %25 = arith.addf %23, %24 : vector<8x32xf32>
    %c0_10 = arith.constant 0 : index
    %c0_11 = arith.constant 0 : index
    %26 = vector.load %arg5[%c0_10, %c0_11] : memref<32x96xf32, #tpu.memory_space<vmem>>, vector<32x96xf32>
    %cst_12 = arith.constant dense<0.000000e+00> : vector<8x96xf32>
    %27 = tpu.matmul %25, %26, %cst_12 {dimension_numbers = #tpu.dot_dimension_numbers<[1], [0], [0], [1], [0, 0, 1, 1], [], []>} : vector<8x32xf32>, vector<32x96xf32>, vector<8x96xf32> -> vector<8x96xf32>
    %28 = vector.extract_strided_slice %27 {offsets = [0, 0], sizes = [8, 32], strides = [1, 1]} : vector<8x96xf32> to vector<8x32xf32>
    %c0_13 = arith.constant 0 : index
    %c0_14 = arith.constant 0 : index
    %c0_15 = arith.constant 0 : index
    %29 = vector.load %arg6[%c0_13, %c0_14, %c0_15] : memref<1x8x32xf32, #tpu.memory_space<vmem>>, vector<1x8x32xf32>
    %30 = vector.shape_cast %29 : vector<1x8x32xf32> to vector<8x32xf32>
    %31 = vector.shape_cast %28 : vector<8x32xf32> to vector<1x8x32xf32>
    tpu.vector_store %arg6[%c0_13, %c0_14, %c0_15], %31 {strides = array<i32>} : memref<1x8x32xf32, #tpu.memory_space<vmem>>, vector<1x8x32xf32>,
    %32 = vector.extract_strided_slice %27 {offsets = [0, 32], sizes = [8, 32], strides = [1, 1]} : vector<8x96xf32> to vector<8x32xf32>
    %c0_16 = arith.constant 0 : index
    %c0_17 = arith.constant 0 : index
    %c0_18 = arith.constant 0 : index
    %33 = vector.load %arg7[%c0_16, %c0_17, %c0_18] : memref<1x8x32xf32, #tpu.memory_space<vmem>>, vector<1x8x32xf32>
    %34 = vector.shape_cast %33 : vector<1x8x32xf32> to vector<8x32xf32>
    %35 = vector.shape_cast %32 : vector<8x32xf32> to vector<1x8x32xf32>
    tpu.vector_store %arg7[%c0_16, %c0_17, %c0_18], %35 {strides = array<i32>} : memref<1x8x32xf32, #tpu.memory_space<vmem>>, vector<1x8x32xf32>,
    %36 = vector.extract_strided_slice %27 {offsets = [0, 64], sizes = [8, 32], strides = [1, 1]} : vector<8x96xf32> to vector<8x32xf32>
    %c0_19 = arith.constant 0 : index
    %c0_20 = arith.constant 0 : index
    %c0_21 = arith.constant 0 : index
    %37 = vector.load %arg8[%c0_19, %c0_20, %c0_21] : memref<1x8x32xf32, #tpu.memory_space<vmem>>, vector<1x8x32xf32>
    %38 = vector.shape_cast %37 : vector<1x8x32xf32> to vector<8x32xf32>
    %39 = vector.shape_cast %36 : vector<8x32xf32> to vector<1x8x32xf32>
    tpu.vector_store %arg8[%c0_19, %c0_20, %c0_21], %39 {strides = array<i32>} : memref<1x8x32xf32, #tpu.memory_space<vmem>>, vector<1x8x32xf32>,
    return
  }
  func.func @transform_0(%arg0: i32, %arg1: i32) -> (i32, i32, i32) {
    %c0_i32 = arith.constant 0 : i32
    %c0_i32_0 = arith.constant 0 : i32
    return %arg0, %arg1, %c0_i32 : i32, i32, i32
  }
  func.func @transform_1(%arg0: i32, %arg1: i32) -> (i32, i32) {
    %c0_i32 = arith.constant 0 : i32
    %c0_i32_0 = arith.constant 0 : i32
    %c0_i32_1 = arith.constant 0 : i32
    return %c0_i32, %c0_i32_0 : i32, i32
  }
  func.func @transform_2(%arg0: i32, %arg1: i32) -> (i32, i32) {
    %c0_i32 = arith.constant 0 : i32
    %c0_i32_0 = arith.constant 0 : i32
    %c0_i32_1 = arith.constant 0 : i32
    return %c0_i32, %c0_i32_0 : i32, i32
  }
  func.func @transform_3(%arg0: i32, %arg1: i32) -> (i32, i32) {
    %c0_i32 = arith.constant 0 : i32
    %c0_i32_0 = arith.constant 0 : i32
    %c0_i32_1 = arith.constant 0 : i32
    return %c0_i32, %c0_i32_0 : i32, i32
  }
  func.func @transform_4(%arg0: i32, %arg1: i32) -> (i32, i32, i32) {
    %c0_i32 = arith.constant 0 : i32
    %c0_i32_0 = arith.constant 0 : i32
    return %arg0, %arg1, %c0_i32 : i32, i32, i32
  }
  func.func @transform_5(%arg0: i32, %arg1: i32) -> (i32, i32, i32) {
    %c0_i32 = arith.constant 0 : i32
    %c0_i32_0 = arith.constant 0 : i32
    return %arg0, %arg1, %c0_i32 : i32, i32, i32
  }
  func.func @transform_6(%arg0: i32, %arg1: i32) -> (i32, i32, i32) {
    %c0_i32 = arith.constant 0 : i32
    %c0_i32_0 = arith.constant 0 : i32
    return %arg0, %arg1, %c0_i32 : i32, i32, i32
  }
}

</mosaic_0001>

<bundles_post_ra>
// kernel: tpu_custom_call.1
= control target key start
LH: loop header
LB: loop body
LE: loop exit
PB: predicated region body
PF: predicated region fallthrough
CT: control target
= control target key end

     0   :  { %s1342_s0 = inlined_call_operand.hbm [shape: f32[2,8,32], index: 0, kind: input, shape index: {}]   ;;  %s1343_s1 = inlined_call_operand.vmem [shape: f32[1,32], index: 1, kind: input, shape index: {}]   ;;  %s1344_s2 = inlined_call_operand.vmem [shape: f32[1,32], index: 2, kind: input, shape index: {}]   ;;  %s1345_s3 = inlined_call_operand.hbm [shape: f32[32,96], index: 3, kind: input, shape index: {}]   ;;  %s1346_s4 = inlined_call_operand.hbm [shape: f32[2,8,32], index: 4, kind: output, shape index: {0}]   ;;  %s1347_s5 = inlined_call_operand.hbm [shape: f32[2,8,32], index: 5, kind: output, shape index: {1}]   ;;  %s1348_s6 = inlined_call_operand.hbm [shape: f32[2,8,32], index: 6, kind: output, shape index: {2}]  }
   0x1   :  { %1353 = sst [smem:[#allocation15_spill]] %s1345_s3 }
   0x2   :  { %12 = vsyncpa [#allocation3], 0 }
   0x3   :  { %14 = vsyncpa [#allocation3 + $0x1], 0 }
   0x4   :  { %15 = vsyncpa [#allocation6], 0 }
   0x5   :  { %16 = vsyncpa [#allocation4], 0 }
   0x6   :  { %18 = vsyncpa [#allocation4 + $0x1], 0 }
   0x7   :  { %19 = vsyncpa [#allocation9], 0 }
   0x8   :  { %21 = vsyncpa [#allocation9 + $0x1], 0  ;;  %s1037_s21 = smov 0   ;;  %s1039_s22 = smov 0  }
   0x9   :  { %s1041_s23 = smov 0   ;;  %s1043_s24 = smov 0  }
   0xa   :  { %s1045_s25 = smov 0   ;;  %s1047_s26 = smov 0  }
   0xb LB: > { %s1068_s27 = sadd.s32 4294967295, %s988_s26   ;;  %s1352_s28 = sadd.s32 4294967294, %s988_s26   ;;  %s988_s26 = sphi %s1047_s26, %s27_s26   ;;  %s984_s25 = sphi %s1045_s25, %s1374_s25   ;;  %s980_s24 = sphi %s1043_s24, %s1373_s24   ;;  %s976_s23 = sphi %s1041_s23, %s1372_s23   ;;  %s972_s22 = sphi %s1039_s22, %s1371_s22   ;;  %s968_s21 = sphi %s1037_s21, %s1370_s21  }
   0xc   : > { %p61_p0 = scmp.ne.s32.totalorder %s972_s22, %s968_s21  ;;  %p1349_p1 = scmp.eq.s32.totalorder %s1068_s27, 0 }
   0xd   : > { %p156_p3 = scmp.eq.s32.totalorder %s1352_s28, 1  ;;  %p648_p5 = scmp.ge.s32.totalorder %s988_s26, 1 }
   0xe   : > { %p1079_p4 = por %p1349_p1, %p61_p0  ;;  %p219_p7 = scmp.lt.s32.totalorder %s988_s26, 3 }
   0xf   : > { %p1084_p6 = por %p156_p3, %p61_p0  ;;  %s990_s8 = smov [#allocation5]  }
  0x10   : > { %s1354_s29 = scalar_select %p1079_p4, 1, 0 }
  0x11   : > { %s1355_s30 = scalar_select %p1084_p6, 1, 0 }
  0x12   : > { %p1089_p8 = pnand %p648_p5, %p219_p7  ;;  %s237_s9 = sshll.u32 %s990_s8, 4  ;;  %s238_s9 = int_to_ptr.vmem [resolvable:$true] %s237_s9 }
  0x13   : > { %s39_s11 = sadd.s32 1, %s984_s25  ;;  %s1358_s3 = sld [smem:[#allocation15_spill]] }
  0x14   : > { %s1356_s7 = scalar_select %p1089_p8, 1, 0 }
  0x15   : > { %p704_p9 = pneg %p1089_p8 }
  0x17   : > { %p1098_p11 = pnand %p704_p9, %p1349_p1 }
  0x19   : > { %s784_s14 = scalar_lea.hbm %s1358_s3, 512  ;;  %p786_p13 = pneg %p1098_p11 }
  0x1a   : > { %p785_p12 = scmp.ne.s32.totalorder %s1358_s3, %s784_s14  ;;  %p791_p5 = scmp.lt.u32.totalorder %s784_s14, %s1358_s3 }
  0x1c   : > { %p787_p0 = pnand %p786_p13, %p785_p12 }
  0x1e   : > { %p788_p3 = pneg %p787_p0 }
  0x20   : > { %p793_p7 = pnand %p791_p5, %p788_p3 }
  0x22   : > { %796 = shalt.err (!%p793_p7)
}
  0x23   : > { %s797_s19 = scalar_lea.vmem %s238_s9, 512  ;;  %p805_p2 = scmp.lt.s32.totalorder %s238_s9, %s238_s9 }
  0x24   : > { %p798_p9 = scmp.ne.s32.totalorder %s238_s9, %s797_s19  ;;  %p806_p6 = scmp.lt.s32.totalorder %s797_s19, %s797_s19 }
  0x26   : > { %p800_p10 = pnand %p798_p9, %p786_p13  ;;  %p807_p4 = por %p806_p6, %p805_p2 }
  0x28   : > { %p801_p1 = pneg %p800_p10 }
  0x2a   : > { %p808_p8 = pnand %p807_p4, %p801_p1 }
  0x2c   : > { %811 = shalt.err (!%p808_p8)
}
  0x2d   : > { %s991_s20 = smov 128   ;;  %s992_s8 = smov 8  }
  0x2e   : > { %707 = dma.hbm_to_vmem [thread:$0]  (!%p1098_p11), %s1358_s3, 512, %s238_s9, [#allocation6], %s991_s20, %s991_s20, %s992_s8  }
  0x2f   : > { %p41_p1 = scmp.ge.s32.totalorder %s39_s11, 2  ;;  %s48_s14 = sadd.s32 1, %s976_s23 }
  0x30   : > { %p55_p2 = scmp.ne.s32.totalorder %s976_s23, %s972_s22  ;;  %p56_p4 = scmp.eq.s32.totalorder %s988_s26, 0 }
  0x31   : > { %s1376_s11 = smov (%p41_p1, %s39_s11), 0  ;;  %p1360_p8 = scmp.eq.s32.totalorder %s1068_s27, 1 }
  0x32   : > { %p1125_p6 = por %p56_p4, %p55_p2  ;;  %s43_s10 = ssub.s32 %s984_s25, %s1376_s11 }
  0x33   : > { %p1131_p10 = por %p1360_p8, %p55_p2  ;;  %p723_p12 = scmp.lt.s32.totalorder %s988_s26, 2 }
  0x34   : > { %p46_p11 = scmp.eq.s32.totalorder %s43_s10, 0  ;;  %s251_s9 = sand.u32 1, %s976_s23  }
  0x35   : > { %s651_s17 = sshll.u32 %s251_s9, 3  ;;  %s652_s19 = sshll.u32 %s984_s25, 7 }
  0x36   : > { %s1140_s18 = scalar_select %p46_p11, %s976_s23, %s48_s14  }
  0x37   : > { %s1146_s12 = scalar_lea.hbm %s1342_s0, %s652_s19  ;;  %s255_s13 = scalar_lea.vmem [#allocation2], %s651_s17 }
  0x38   : > { %s263_s28 = sshll.u32 %s255_s13, 4  ;;  %p1152_p13 = pnand %p723_p12, %p1125_p6  ;;  %s1148_s28 = int_to_ptr.vmem [resolvable:$true] %s263_s28 }
  0x39   : > { %s252_s14 = scalar_lea.sflag [#allocation3], %s251_s9  ;;  %s812_s3 = scalar_lea.hbm %s1146_s12, 128 }
  0x3a   : > { %p813_p0 = scmp.ne.s32.totalorder %s1146_s12, %s812_s3  ;;  %p814_p3 = pneg %p1152_p13 }
  0x3b   : > { %s817_s20 = scalar_lea.hbm %s1342_s0, 256  ;;  %p818_p9 = scmp.lt.u32.totalorder %s1146_s12, %s1342_s0 }
  0x3c   : > { %p815_p5 = pnand %p814_p3, %p813_p0  ;;  %p819_p1 = scmp.lt.u32.totalorder %s817_s20, %s812_s3 }
  0x3d   : > { %p821_p4 = scmp.lt.u32.totalorder %s812_s3, %s1146_s12 }
  0x3e   : > { %p816_p7 = pneg %p815_p5  ;;  %p820_p2 = por %p819_p1, %p818_p9 }
  0x40   : > { %p822_p6 = por %p821_p4, %p820_p2 }
  0x42   : > { %p823_p8 = pnand %p822_p6, %p816_p7 }
  0x44   : > { %826 = shalt.err (!%p823_p8)
}
  0x45   : > { %s827_s9 = scalar_lea.vmem %s1148_s28, 128  ;;  %s993_s13 = smov [#allocation2]  }
  0x46   : > { %p828_p12 = scmp.ne.s32.totalorder %s1148_s28, %s827_s9  ;;  %s832_s17 = sshll.u32 %s993_s13, 4  ;;  %s833_s17 = int_to_ptr.vmem [resolvable:$false] %s832_s17 }
  0x47   : > { %s834_s19 = scalar_lea.vmem %s833_s17, 256  ;;  %p835_p5 = scmp.lt.s32.totalorder %s1148_s28, %s833_s17 }
  0x48   : > { %p830_p11 = pnand %p828_p12, %p814_p3  ;;  %p836_p9 = scmp.lt.s32.totalorder %s834_s19, %s827_s9 }
  0x4a   : > { %p831_p0 = pneg %p830_p11  ;;  %p837_p1 = por %p836_p9, %p835_p5 }
  0x4c   : > { %p838_p2 = pnand %p837_p1, %p831_p0 }
  0x4e   : > { %841 = shalt.err (!%p838_p2)
}
  0x4f   : > { %711 = dma.hbm_to_vmem [thread:$0]  (!%p1152_p13), %s1146_s12, 128, %s1148_s28, %s252_s14  }
  0x50   : > { %p1363_p7 = scmp.ne.s32.totalorder %s1356_s7, 0 }
  0x51   : > { %s1184_s3 = sand.u32 (!%p1363_p7), 1, %s972_s22   ;;  %p1364_p3 = scmp.ne.s32.totalorder (!%p1363_p7), %s1354_s29, 0 }
  0x52   : > { %272 = sbr.rel (%p1363_p7) target bundleno = 771 (0x303), region = 36  ;;  %s1187_s20 = sshll.u32 (!%p1363_p7), %s1184_s3, 3 }
  0x53   : > { %s275_s15 = scalar_lea.sflag (!%p1363_p7), [#allocation3], %s1184_s3  ;;  %s278_s8 = scalar_lea.vmem (!%p1363_p7), [#allocation2], %s1187_s20 }
  0x59   : > { %951 = dma.done.wait (%p1364_p3), %s275_s15, 128  }
  0x5a   : > { %953 = vsyncadd (%p1364_p3), %s275_s15, 4294967168  ;;  %p1365_p13 = scmp.eq.s32.totalorder %s1068_s27, 0 }
  0x5c   : > { %955 = dma.done.wait (%p1365_p13), [#allocation6], 512   ;;  %p1366_p4 = pmov %p1365_p13 }
  0x5d   : > { %vm324_vm0 = vcmask 261120   ;;  %v321_v0 = vld [vmem:[%s278_s8] sm:$0xff]  ;;  %v353_v7 = vld [vmem:[#allocation5] sm:$0xff]  ;;  %v354_v8 = vld [vmem:[#allocation5 + $0x8] sm:$0xff]  ;;  %v994_v10 = vmov 0.0|0.0   ;;  %vm995_vm1 = vmmov 0  }
  0x5e   : > { %957 = vsyncadd (%p1366_p4), [#allocation6], 4294966784  ;;  %v325_v1 = vsel %vm324_vm0, %v321_v0, 0.0  ;;  %v355_v9 = vld [vmem:[#allocation5 + $0x10] sm:$0xff]  ;;  %686 = vmatprep.subr.bf16.mxu0 %v994_v10  ;;  %v687_v11 = vpack.c.bf16 %v354_v8, %v353_v7  ;;  %v356_v12 = vld [vmem:[#allocation5 + $0x18] sm:$0xff]  ;;  %v996_v13 = vmov 0.0  }
  0x5f   : > { %326 = vadd.xlane.f32.xlu0 %v325_v1  ;;  %683 = vmatprep.mubr.msk.f32.mxu0 %vm995_vm1, %v996_v13  ;;  %v690_v14 = vpack.c.bf16 %v356_v12, %v355_v9  ;;  %v659_v19 = vld [vmem:[%s1343_s1] ss:$0 sm:$0xff]  ;;  %s1209_s10 = sshll.u32 %s980_s24, 7  ;;  %s306_s14 = scalar_lea.vmem [#allocation7], %s1187_s20 }
  0x60   : > { %688 = vmatpush3.bf16.msra.mxu0 %v687_v11  ;;  %v660_v21 = vld [vmem:[%s1344_s2] ss:$0 sm:$0xff]  ;;  %s465_s9 = sshll.u32 %s306_s14, 4  ;;  %s1216_s19 = scalar_lea.hbm %s1346_s4, %s1209_s10  ;;  %s1218_s9 = int_to_ptr.vmem [resolvable:$true] %s465_s9 }
  0x61   : > { %689 = vmatprep.subr.bf16.mxu0 %v994_v10  ;;  %s997_s15 = smov 96   ;;  %s441_s24 = scalar_lea.sflag [#allocation4], %s1184_s3 }
  0x62   : > { %s842_s8 = scalar_lea.vmem %s1218_s9, 128  ;;  %s998_s28 = smov [#allocation7]  }
  0x63   : > { %p843_p6 = scmp.ne.s32.totalorder %s1218_s9, %s842_s8  ;;  %s846_s29 = sshll.u32 %s998_s28, 4  ;;  %s847_s29 = int_to_ptr.vmem [resolvable:$false] %s846_s29 }
  0x64   : > { %691 = vmatpush3.bf16.msra.mxu0 %v690_v14  ;;  %s848_s7 = scalar_lea.vmem %s847_s29, 256  ;;  %p849_p11 = scmp.lt.s32.totalorder %s1218_s9, %s847_s29 }
  0x65   : > { %p844_p8 = pnand %p843_p6, %p1131_p10  ;;  %p850_p0 = scmp.lt.s32.totalorder %s848_s7, %s842_s8 }
  0x67   : > { %p845_p12 = pneg %p844_p8  ;;  %p851_p5 = por %p850_p0, %p849_p11 }
  0x69   : > { %p852_p9 = pnand %p851_p5, %p845_p12 }
  0xec   : > { %v327_v2 = vpop.xlane.xlu0 %326 }
  0xed   : > { %v329_v3 = vmul.f32 0.03125, %v327_v2 }
  0xef   : > { %v330_v4 = vsub.f32 %v321_v0, %v329_v3 }
  0xf1   : > { %v331_v5 = vmul.f32 %v330_v4, %v330_v4 }
  0xf3   : > { %v332_v6 = vsel %vm324_vm0, %v331_v5, 0.0 }
  0xf4   : > { %333 = vadd.xlane.f32.xlu0 %v332_v6 }
 0x181   : > { %v334_v15 = vpop.xlane.xlu0 %333 }
 0x182   : > { %v335_v16 = vmul.f32 0.03125, %v334_v15 }
 0x184   : > { %v336_v17 = vadd.f32 1e-05, %v335_v16 }
 0x186   : > { %782 = vrsqrt.f32 %v336_v17 }
 0x190   : > { %v783_v18 = vpop.eup %782 }
 0x191   : > { %v338_v20 = vmul.f32 %v783_v18, %v330_v4 }
 0x193   : > { %v345_v22 = vmul.f32 %v659_v19, %v338_v20 }
 0x195   : > { %v352_v23 = vadd.f32 %v660_v21, %v345_v22 }
 0x197   : > { %684 = vmatmul.mubr.msk.f32.vlgmr.msra.gmra.mrb[0].mxu0 %vm324_vm0, %v352_v23 }
 0x26a   : > { %v426_v24 = vpop.f32.mrb[0].mxu0 }
 0x26b   : > { %430 = vst.msk [vmem:[%s306_s14] sm:$0xff] %vm324_vm0, %v426_v24  ;;  %432 = vrot.lane.b32.xlu1 %v426_v24, %s997_s15  ;;  %v685_v25 = vpop.f32.mrb[1].mxu0 }
 0x26c   : > { %855 = shalt.err (!%p852_p9)
}
 0x26d   : > { %s856_s3 = scalar_lea.hbm %s1216_s19, 128  ;;  %s860_s13 = scalar_lea.hbm %s1346_s4, 256 }
 0x26e   : > { %p857_p1 = scmp.ne.s32.totalorder %s1216_s19, %s856_s3  ;;  %p861_p3 = scmp.lt.u32.totalorder %s1216_s19, %s1346_s4 }
 0x26f   : > { %p862_p13 = scmp.lt.u32.totalorder %s860_s13, %s856_s3  ;;  %p864_p6 = scmp.lt.u32.totalorder %s856_s3, %s1216_s19 }
 0x270   : > { %p858_p2 = pnand %p857_p1, %p1131_p10 }
 0x271   : > { %p863_p4 = por %p862_p13, %p861_p3 }
 0x272   : > { %p859_p7 = pneg %p858_p2 }
 0x273   : > { %p865_p8 = por %p864_p6, %p863_p4 }
 0x275   : > { %p866_p12 = pnand %p865_p8, %p859_p7 }
 0x277   : > { %869 = shalt.err (!%p866_p12)
}
 0x278   : > { %698 = dma.vmem_to_hbm [thread:$0]  (%p1131_p10), %s1218_s9, 128, %s1216_s19, %s441_s24  }
 0x279   : > { %s999_s8 = smov 64   ;;  %s445_s28 = sand.u32 1, %s1068_s27  }
 0x27a   : > { %436 = vrot.lane.b32.xlu1 %v426_v24, %s999_s8  ;;  %s313_s29 = scalar_lea.vmem [#allocation8], %s1187_s20  ;;  %s1249_s14 = scalar_lea.hbm %s1347_s5, %s1209_s10 }
 0x27b   : > { %s479_s7 = sshll.u32 %s313_s29, 4  ;;  %s320_s13 = scalar_lea.vmem [#allocation10], %s1187_s20  ;;  %s1251_s7 = int_to_ptr.vmem [resolvable:$true] %s479_s7 }
 0x27c   : > { %s1256_s17 = sshll.u32 %s320_s13, 4  ;;  %s1259_s27 = scalar_lea.sflag [#allocation9], %s445_s28  ;;  %s1290_s17 = int_to_ptr.vmem [resolvable:$true] %s1256_s17 }
 0x27d   : > { %s870_s9 = scalar_lea.vmem %s1251_s7, 128  ;;  %s1000_s19 = smov [#allocation8]  }
 0x27e   : > { %p871_p11 = scmp.ne.s32.totalorder %s1251_s7, %s870_s9  ;;  %s874_s24 = sshll.u32 %s1000_s19, 4  ;;  %s875_s24 = int_to_ptr.vmem [resolvable:$false] %s874_s24 }
 0x27f   : > { %s876_s15 = scalar_lea.vmem %s875_s24, 256  ;;  %p877_p9 = scmp.lt.s32.totalorder %s1251_s7, %s875_s24 }
 0x280   : > { %p872_p0 = pnand %p871_p11, %p1131_p10  ;;  %p878_p1 = scmp.lt.s32.totalorder %s876_s15, %s870_s9 }
 0x282   : > { %p873_p5 = pneg %p872_p0  ;;  %p879_p2 = por %p878_p1, %p877_p9 }
 0x284   : > { %p880_p7 = pnand %p879_p2, %p873_p5 }
 0x2dd   : > { %v433_v26 = vpop.permute.xlu1 %432 }
 0x2de   : > { %435 = vst.msk [vmem:[%s313_s29] sm:$0xff] %vm324_vm0, %v433_v26 }
 0x2df   : > { %883 = shalt.err (!%p880_p7)
}
 0x2e0   : > { %s884_s8 = scalar_lea.hbm %s1249_s14, 128  ;;  %s888_s3 = scalar_lea.hbm %s1347_s5, 256 }
 0x2e1   : > { %p885_p3 = scmp.ne.s32.totalorder %s1249_s14, %s884_s8  ;;  %p889_p6 = scmp.lt.u32.totalorder %s1249_s14, %s1347_s5 }
 0x2e2   : > { %p890_p8 = scmp.lt.u32.totalorder %s888_s3, %s884_s8  ;;  %p892_p11 = scmp.lt.u32.totalorder %s884_s8, %s1249_s14 }
 0x2e3   : > { %p886_p13 = pnand %p885_p3, %p1131_p10 }
 0x2e4   : > { %p891_p12 = por %p890_p8, %p889_p6 }
 0x2e5   : > { %p887_p4 = pneg %p886_p13 }
 0x2e6   : > { %p893_p0 = por %p892_p11, %p891_p12 }
 0x2e8   : > { %p894_p5 = pnand %p893_p0, %p887_p4 }
 0x2ea   : > { %897 = shalt.err (!%p894_p5)
}
 0x2eb   : > { %699 = dma.vmem_to_hbm [thread:$0]  (%p1131_p10), %s1251_s7, 128, %s1249_s14, %s1259_s27  }
 0x2ec   : > { %s1287_s15 = scalar_lea.hbm %s1348_s6, %s1209_s10  ;;  %v437_v27 = vpop.permute.xlu1 %436  ;;  %s898_s8 = scalar_lea.vmem %s1290_s17, 128 }
 0x2ed   : > { %439 = vst.msk [vmem:[%s320_s13] sm:$0xff] %vm324_vm0, %v437_v27  ;;  %p899_p9 = scmp.ne.s32.totalorder %s1290_s17, %s898_s8  ;;  %s1001_s7 = smov [#allocation10]  }
 0x2ee   : > { %s902_s14 = sshll.u32 %s1001_s7, 4  ;;  %s903_s14 = int_to_ptr.vmem [resolvable:$false] %s902_s14 }
 0x2ef   : > { %p900_p1 = pnand %p899_p9, %p1131_p10  ;;  %s904_s28 = scalar_lea.vmem %s903_s14, 256 }
 0x2f0   : > { %p905_p7 = scmp.lt.s32.totalorder %s1290_s17, %s903_s14  ;;  %p906_p3 = scmp.lt.s32.totalorder %s904_s28, %s898_s8 }
 0x2f1   : > { %p901_p2 = pneg %p900_p1 }
 0x2f2   : > { %p907_p13 = por %p906_p3, %p905_p7 }
 0x2f4   : > { %p908_p4 = pnand %p907_p13, %p901_p2 }
 0x2f6   : > { %911 = shalt.err (!%p908_p4)
}
 0x2f7   : > { %s912_s20 = scalar_lea.hbm %s1287_s15, 128  ;;  %s916_s29 = scalar_lea.hbm %s1348_s6, 256 }
 0x2f8   : > { %p913_p6 = scmp.ne.s32.totalorder %s1287_s15, %s912_s20  ;;  %p917_p11 = scmp.lt.u32.totalorder %s1287_s15, %s1348_s6 }
 0x2f9   : > { %p918_p0 = scmp.lt.u32.totalorder %s916_s29, %s912_s20  ;;  %p920_p9 = scmp.lt.u32.totalorder %s912_s20, %s1287_s15 }
 0x2fa   : > { %p914_p8 = pnand %p913_p6, %p1131_p10 }
 0x2fb   : > { %p919_p5 = por %p918_p0, %p917_p11 }
 0x2fc   : > { %p915_p12 = pneg %p914_p8 }
 0x2fd   : > { %p921_p1 = por %p920_p9, %p919_p5 }
 0x2ff   : > { %p922_p2 = pnand %p921_p1, %p915_p12 }
 0x301   : > { %925 = shalt.err (!%p922_p2)
}
 0x302   : > { %700 = dma.vmem_to_hbm [thread:$0]  (%p1131_p10), %s1290_s17, 128, %s1287_s15, %s1259_s27  }
 0x303 PF: > { %s505_s19 = sand.u32 1, %s968_s21   ;;  %p1367_p7 = scmp.ne.s32.totalorder %s1355_s30, 0 }
 0x304   : > { %p1368_p3 = scmp.ge.s32.totalorder %s988_s26, 2  ;;  %s506_s9 = scalar_lea.sflag [#allocation4], %s505_s19 }
 0x306   : > { %p713_p13 = pnand %p1368_p3, %p1367_p7 }
 0x308   : > { %959 = dma.done.wait (!%p713_p13), %s506_s9, 128  }
 0x309   : > { %961 = vsyncadd (!%p713_p13), %s506_s9, 4294967168  ;;  %s1369_s24 = sadd.s32 4294967294, %s988_s26  }
 0x30a   : > { %s514_s8 = sand.u32 1, %s1369_s24  }
 0x30b   : > { %s515_s7 = scalar_lea.sflag [#allocation9], %s514_s8 }
 0x30c   : > { %963 = dma.done.wait (!%p713_p13), %s515_s7, 256  }
 0x30d   : > { %965 = vsyncadd (!%p713_p13), %s515_s7, 4294967040  ;;  %s27_s26 = sadd.s32 1, %s988_s26   ;;  %s1370_s21 = smov %s972_s22 }
 0x30e   : > { %p24_p10 = scmp.ge.s32.totalorder %s27_s26, 4   ;;  %s1371_s22 = smov %s976_s23 }
 0x30f   : > { %s1372_s23 = smov %s1140_s18  ;;  %s1373_s24 = smov %s984_s25 }
 0x310   : > { %s1374_s25 = smov %s1376_s11  ;;  %26 = sbr.rel (!%p24_p10) target bundleno = 11 (0xb), region = 117 }
 0x317   :  { %529 = vsyncpa [#allocation3], 1 }
 0x318   :  { %531 = vsyncpa [#allocation3 + $0x1], 1 }
 0x319   :  { %532 = vsyncpa [#allocation6], 1 }
 0x31a   :  { %533 = vsyncpa [#allocation4], 1 }
 0x31b   :  { %535 = vsyncpa [#allocation4 + $0x1], 1 }
 0x31c   :  { %536 = vsyncpa [#allocation9], 1 }
 0x31d   :  { %538 = vsyncpa [#allocation9 + $0x1], 1 }

// kernel: tpu_custom_call.1
= control target key start
LH: loop header
LB: loop body
LE: loop exit
PB: predicated region body
PF: predicated region fallthrough
CT: control target
= control target key end

     0   :  { %s1342_s0 = inlined_call_operand.hbm [shape: f32[2,8,32], index: 0, kind: input, shape index: {}]   ;;  %s1343_s1 = inlined_call_operand.vmem [shape: f32[1,32], index: 1, kind: input, shape index: {}]   ;;  %s1344_s2 = inlined_call_operand.vmem [shape: f32[1,32], index: 2, kind: input, shape index: {}]   ;;  %s1345_s3 = inlined_call_operand.hbm [shape: f32[32,96], index: 3, kind: input, shape index: {}]   ;;  %s1346_s4 = inlined_call_operand.hbm [shape: f32[2,8,32], index: 4, kind: output, shape index: {0}]   ;;  %s1347_s5 = inlined_call_operand.hbm [shape: f32[2,8,32], index: 5, kind: output, shape index: {1}]   ;;  %s1348_s6 = inlined_call_operand.hbm [shape: f32[2,8,32], index: 6, kind: output, shape index: {2}]  }
   0x1   :  { %1353 = sst [smem:[#allocation15_spill]] %s1345_s3 }
   0x2   :  { %12 = vsyncpa [#allocation3], 0 }
   0x3   :  { %14 = vsyncpa [#allocation3 + $0x1], 0 }
   0x4   :  { %15 = vsyncpa [#allocation6], 0 }
   0x5   :  { %16 = vsyncpa [#allocation4], 0 }
   0x6   :  { %18 = vsyncpa [#allocation4 + $0x1], 0 }
   0x7   :  { %19 = vsyncpa [#allocation9], 0 }
   0x8   :  { %21 = vsyncpa [#allocation9 + $0x1], 0  ;;  %s1037_s21 = smov 0   ;;  %s1039_s22 = smov 0  }
   0x9   :  { %s1041_s23 = smov 0   ;;  %s1043_s24 = smov 0  }
   0xa   :  { %s1045_s25 = smov 0   ;;  %s1047_s26 = smov 0  }
   0xb LB: > { %s1068_s27 = sadd.s32 4294967295, %s988_s26   ;;  %s1352_s28 = sadd.s32 4294967294, %s988_s26   ;;  %s988_s26 = sphi %s1047_s26, %s27_s26   ;;  %s984_s25 = sphi %s1045_s25, %s1374_s25   ;;  %s980_s24 = sphi %s1043_s24, %s1373_s24   ;;  %s976_s23 = sphi %s1041_s23, %s1372_s23   ;;  %s972_s22 = sphi %s1039_s22, %s1371_s22   ;;  %s968_s21 = sphi %s1037_s21, %s1370_s21  }
   0xc   : > { %p61_p0 = scmp.ne.s32.totalorder %s972_s22, %s968_s21  ;;  %p1349_p1 = scmp.eq.s32.totalorder %s1068_s27, 0 }
   0xd   : > { %p156_p3 = scmp.eq.s32.totalorder %s1352_s28, 1  ;;  %p648_p5 = scmp.ge.s32.totalorder %s988_s26, 1 }
   0xe   : > { %p1079_p4 = por %p1349_p1, %p61_p0  ;;  %p219_p7 = scmp.lt.s32.totalorder %s988_s26, 3 }
   0xf   : > { %p1084_p6 = por %p156_p3, %p61_p0  ;;  %s990_s8 = smov [#allocation5]  }
  0x10   : > { %s1354_s29 = scalar_select %p1079_p4, 1, 0 }
  0x11   : > { %s1355_s30 = scalar_select %p1084_p6, 1, 0 }
  0x12   : > { %p1089_p8 = pnand %p648_p5, %p219_p7  ;;  %s237_s9 = sshll.u32 %s990_s8, 4  ;;  %s238_s9 = int_to_ptr.vmem [resolvable:$true] %s237_s9 }
  0x13   : > { %s39_s11 = sadd.s32 1, %s984_s25  ;;  %s1358_s3 = sld [smem:[#allocation15_spill]] }
  0x14   : > { %s1356_s7 = scalar_select %p1089_p8, 1, 0 }
  0x15   : > { %p704_p9 = pneg %p1089_p8 }
  0x17   : > { %p1098_p11 = pnand %p704_p9, %p1349_p1 }
  0x19   : > { %s784_s14 = scalar_lea.hbm %s1358_s3, 512  ;;  %p786_p13 = pneg %p1098_p11 }
  0x1a   : > { %p785_p12 = scmp.ne.s32.totalorder %s1358_s3, %s784_s14  ;;  %p791_p5 = scmp.lt.u32.totalorder %s784_s14, %s1358_s3 }
  0x1c   : > { %p787_p0 = pnand %p786_p13, %p785_p12 }
  0x1e   : > { %p788_p3 = pneg %p787_p0 }
  0x20   : > { %p793_p7 = pnand %p791_p5, %p788_p3 }
  0x22   : > { %796 = shalt.err (!%p793_p7)
}
  0x23   : > { %s797_s19 = scalar_lea.vmem %s238_s9, 512  ;;  %p805_p2 = scmp.lt.s32.totalorder %s238_s9, %s238_s9 }
  0x24   : > { %p798_p9 = scmp.ne.s32.totalorder %s238_s9, %s797_s19  ;;  %p806_p6 = scmp.lt.s32.totalorder %s797_s19, %s797_s19 }
  0x26   : > { %p800_p10 = pnand %p798_p9, %p786_p13  ;;  %p807_p4 = por %p806_p6, %p805_p2 }
  0x28   : > { %p801_p1 = pneg %p800_p10 }
  0x2a   : > { %p808_p8 = pnand %p807_p4, %p801_p1 }
  0x2c   : > { %811 = shalt.err (!%p808_p8)
}
  0x2d   : > { %s991_s20 = smov 128   ;;  %s992_s8 = smov 8  }
  0x2e   : > { %707 = dma.hbm_to_vmem [thread:$0]  (!%p1098_p11), %s1358_s3, 512, %s238_s9, [#allocation6], %s991_s20, %s991_s20, %s992_s8  }
  0x2f   : > { %p41_p1 = scmp.ge.s32.totalorder %s39_s11, 2  ;;  %s48_s14 = sadd.s32 1, %s976_s23 }
  0x30   : > { %p55_p2 = scmp.ne.s32.totalorder %s976_s23, %s972_s22  ;;  %p56_p4 = scmp.eq.s32.totalorder %s988_s26, 0 }
  0x31   : > { %s1376_s11 = smov (%p41_p1, %s39_s11), 0  ;;  %p1360_p8 = scmp.eq.s32.totalorder %s1068_s27, 1 }
  0x32   : > { %p1125_p6 = por %p56_p4, %p55_p2  ;;  %s43_s10 = ssub.s32 %s984_s25, %s1376_s11 }
  0x33   : > { %p1131_p10 = por %p1360_p8, %p55_p2  ;;  %p723_p12 = scmp.lt.s32.totalorder %s988_s26, 2 }
  0x34   : > { %p46_p11 = scmp.eq.s32.totalorder %s43_s10, 0  ;;  %s251_s9 = sand.u32 1, %s976_s23  }
  0x35   : > { %s651_s17 = sshll.u32 %s251_s9, 3  ;;  %s652_s19 = sshll.u32 %s984_s25, 7 }
  0x36   : > { %s1140_s18 = scalar_select %p46_p11, %s976_s23, %s48_s14  }
  0x37   : > { %s1146_s12 = scalar_lea.hbm %s1342_s0, %s652_s19  ;;  %s255_s13 = scalar_lea.vmem [#allocation2], %s651_s17 }
  0x38   : > { %s263_s28 = sshll.u32 %s255_s13, 4  ;;  %p1152_p13 = pnand %p723_p12, %p1125_p6  ;;  %s1148_s28 = int_to_ptr.vmem [resolvable:$true] %s263_s28 }
  0x39   : > { %s252_s14 = scalar_lea.sflag [#allocation3], %s251_s9  ;;  %s812_s3 = scalar_lea.hbm %s1146_s12, 128 }
  0x3a   : > { %p813_p0 = scmp.ne.s32.totalorder %s1146_s12, %s812_s3  ;;  %p814_p3 = pneg %p1152_p13 }
  0x3b   : > { %s817_s20 = scalar_lea.hbm %s1342_s0, 256  ;;  %p818_p9 = scmp.lt.u32.totalorder %s1146_s12, %s1342_s0 }
  0x3c   : > { %p815_p5 = pnand %p814_p3, %p813_p0  ;;  %p819_p1 = scmp.lt.u32.totalorder %s817_s20, %s812_s3 }
  0x3d   : > { %p821_p4 = scmp.lt.u32.totalorder %s812_s3, %s1146_s12 }
  0x3e   : > { %p816_p7 = pneg %p815_p5  ;;  %p820_p2 = por %p819_p1, %p818_p9 }
  0x40   : > { %p822_p6 = por %p821_p4, %p820_p2 }
  0x42   : > { %p823_p8 = pnand %p822_p6, %p816_p7 }
  0x44   : > { %826 = shalt.err (!%p823_p8)
}
  0x45   : > { %s827_s9 = scalar_lea.vmem %s1148_s28, 128  ;;  %s993_s13 = smov [#allocation2]  }
  0x46   : > { %p828_p12 = scmp.ne.s32.totalorder %s1148_s28, %s827_s9  ;;  %s832_s17 = sshll.u32 %s993_s13, 4  ;;  %s833_s17 = int_to_ptr.vmem [resolvable:$false] %s832_s17 }
  0x47   : > { %s834_s19 = scalar_lea.vmem %s833_s17, 256  ;;  %p835_p5 = scmp.lt.s32.totalorder %s1148_s28, %s833_s17 }
  0x48   : > { %p830_p11 = pnand %p828_p12, %p814_p3  ;;  %p836_p9 = scmp.lt.s32.totalorder %s834_s19, %s827_s9 }
  0x4a   : > { %p831_p0 = pneg %p830_p11  ;;  %p837_p1 = por %p836_p9, %p835_p5 }
  0x4c   : > { %p838_p2 = pnand %p837_p1, %p831_p0 }
  0x4e   : > { %841 = shalt.err (!%p838_p2)
}
  0x4f   : > { %711 = dma.hbm_to_vmem [thread:$0]  (!%p1152_p13), %s1146_s12, 128, %s1148_s28, %s252_s14  }
  0x50   : > { %p1363_p7 = scmp.ne.s32.totalorder %s1356_s7, 0 }
  0x51   : > { %s1184_s3 = sand.u32 (!%p1363_p7), 1, %s972_s22   ;;  %p1364_p3 = scmp.ne.s32.totalorder (!%p1363_p7), %s1354_s29, 0 }
  0x52   : > { %272 = sbr.rel (%p1363_p7) target bundleno = 771 (0x303), region = 36  ;;  %s1187_s20 = sshll.u32 (!%p1363_p7), %s1184_s3, 3 }
  0x53   : > { %s275_s15 = scalar_lea.sflag (!%p1363_p7), [#allocation3], %s1184_s3  ;;  %s278_s8 = scalar_lea.vmem (!%p1363_p7), [#allocation2], %s1187_s20 }
  0x59   : > { %951 = dma.done.wait (%p1364_p3), %s275_s15, 128  }
  0x5a   : > { %953 = vsyncadd (%p1364_p3), %s275_s15, 4294967168  ;;  %p1365_p13 = scmp.eq.s32.totalorder %s1068_s27, 0 }
  0x5c   : > { %955 = dma.done.wait (%p1365_p13), [#allocation6], 512   ;;  %p1366_p4 = pmov %p1365_p13 }
  0x5d   : > { %vm324_vm0 = vcmask 261120   ;;  %v321_v0 = vld [vmem:[%s278_s8] sm:$0xff]  ;;  %v353_v7 = vld [vmem:[#allocation5] sm:$0xff]  ;;  %v354_v8 = vld [vmem:[#allocation5 + $0x8] sm:$0xff]  ;;  %v994_v10 = vmov 0.0|0.0   ;;  %vm995_vm1 = vmmov 0  }
  0x5e   : > { %957 = vsyncadd (%p1366_p4), [#allocation6], 4294966784  ;;  %v325_v1 = vsel %vm324_vm0, %v321_v0, 0.0  ;;  %v355_v9 = vld [vmem:[#allocation5 + $0x10] sm:$0xff]  ;;  %686 = vmatprep.subr.bf16.mxu0 %v994_v10  ;;  %v687_v11 = vpack.c.bf16 %v354_v8, %v353_v7  ;;  %v356_v12 = vld [vmem:[#allocation5 + $0x18] sm:$0xff]  ;;  %v996_v13 = vmov 0.0  }
  0x5f   : > { %326 = vadd.xlane.f32.xlu0 %v325_v1  ;;  %683 = vmatprep.mubr.msk.f32.mxu0 %vm995_vm1, %v996_v13  ;;  %v690_v14 = vpack.c.bf16 %v356_v12, %v355_v9  ;;  %v659_v19 = vld [vmem:[%s1343_s1] ss:$0 sm:$0xff]  ;;  %s1209_s10 = sshll.u32 %s980_s24, 7  ;;  %s306_s14 = scalar_lea.vmem [#allocation7], %s1187_s20 }
  0x60   : > { %688 = vmatpush3.bf16.msra.mxu0 %v687_v11  ;;  %v660_v21 = vld [vmem:[%s1344_s2] ss:$0 sm:$0xff]  ;;  %s465_s9 = sshll.u32 %s306_s14, 4  ;;  %s1216_s19 = scalar_lea.hbm %s1346_s4, %s1209_s10  ;;  %s1218_s9 = int_to_ptr.vmem [resolvable:$true] %s465_s9 }
  0x61   : > { %689 = vmatprep.subr.bf16.mxu0 %v994_v10  ;;  %s997_s15 = smov 96   ;;  %s441_s24 = scalar_lea.sflag [#allocation4], %s1184_s3 }
  0x62   : > { %s842_s8 = scalar_lea.vmem %s1218_s9, 128  ;;  %s998_s28 = smov [#allocation7]  }
  0x63   : > { %p843_p6 = scmp.ne.s32.totalorder %s1218_s9, %s842_s8  ;;  %s846_s29 = sshll.u32 %s998_s28, 4  ;;  %s847_s29 = int_to_ptr.vmem [resolvable:$false] %s846_s29 }
  0x64   : > { %691 = vmatpush3.bf16.msra.mxu0 %v690_v14  ;;  %s848_s7 = scalar_lea.vmem %s847_s29, 256  ;;  %p849_p11 = scmp.lt.s32.totalorder %s1218_s9, %s847_s29 }
  0x65   : > { %p844_p8 = pnand %p843_p6, %p1131_p10  ;;  %p850_p0 = scmp.lt.s32.totalorder %s848_s7, %s842_s8 }
  0x67   : > { %p845_p12 = pneg %p844_p8  ;;  %p851_p5 = por %p850_p0, %p849_p11 }
  0x69   : > { %p852_p9 = pnand %p851_p5, %p845_p12 }
  0xec   : > { %v327_v2 = vpop.xlane.xlu0 %326 }
  0xed   : > { %v329_v3 = vmul.f32 0.03125, %v327_v2 }
  0xef   : > { %v330_v4 = vsub.f32 %v321_v0, %v329_v3 }
  0xf1   : > { %v331_v5 = vmul.f32 %v330_v4, %v330_v4 }
  0xf3   : > { %v332_v6 = vsel %vm324_vm0, %v331_v5, 0.0 }
  0xf4   : > { %333 = vadd.xlane.f32.xlu0 %v332_v6 }
 0x181   : > { %v334_v15 = vpop.xlane.xlu0 %333 }
 0x182   : > { %v335_v16 = vmul.f32 0.03125, %v334_v15 }
 0x184   : > { %v336_v17 = vadd.f32 1e-05, %v335_v16 }
 0x186   : > { %782 = vrsqrt.f32 %v336_v17 }
 0x190   : > { %v783_v18 = vpop.eup %782 }
 0x191   : > { %v338_v20 = vmul.f32 %v783_v18, %v330_v4 }
 0x193   : > { %v345_v22 = vmul.f32 %v659_v19, %v338_v20 }
 0x195   : > { %v352_v23 = vadd.f32 %v660_v21, %v345_v22 }
 0x197   : > { %684 = vmatmul.mubr.msk.f32.vlgmr.msra.gmra.mrb[0].mxu0 %vm324_vm0, %v352_v23 }
 0x26a   : > { %v426_v24 = vpop.f32.mrb[0].mxu0 }
 0x26b   : > { %430 = vst.msk [vmem:[%s306_s14] sm:$0xff] %vm324_vm0, %v426_v24  ;;  %432 = vrot.lane.b32.xlu1 %v426_v24, %s997_s15  ;;  %v685_v25 = vpop.f32.mrb[1].mxu0 }
 0x26c   : > { %855 = shalt.err (!%p852_p9)
}
 0x26d   : > { %s856_s3 = scalar_lea.hbm %s1216_s19, 128  ;;  %s860_s13 = scalar_lea.hbm %s1346_s4, 256 }
 0x26e   : > { %p857_p1 = scmp.ne.s32.totalorder %s1216_s19, %s856_s3  ;;  %p861_p3 = scmp.lt.u32.totalorder %s1216_s19, %s1346_s4 }
 0x26f   : > { %p862_p13 = scmp.lt.u32.totalorder %s860_s13, %s856_s3  ;;  %p864_p6 = scmp.lt.u32.totalorder %s856_s3, %s1216_s19 }
 0x270   : > { %p858_p2 = pnand %p857_p1, %p1131_p10 }
 0x271   : > { %p863_p4 = por %p862_p13, %p861_p3 }
 0x272   : > { %p859_p7 = pneg %p858_p2 }
 0x273   : > { %p865_p8 = por %p864_p6, %p863_p4 }
 0x275   : > { %p866_p12 = pnand %p865_p8, %p859_p7 }
 0x277   : > { %869 = shalt.err (!%p866_p12)
}
 0x278   : > { %698 = dma.vmem_to_hbm [thread:$0]  (%p1131_p10), %s1218_s9, 128, %s1216_s19, %s441_s24  }
 0x279   : > { %s999_s8 = smov 64   ;;  %s445_s28 = sand.u32 1, %s1068_s27  }
 0x27a   : > { %436 = vrot.lane.b32.xlu1 %v426_v24, %s999_s8  ;;  %s313_s29 = scalar_lea.vmem [#allocation8], %s1187_s20  ;;  %s1249_s14 = scalar_lea.hbm %s1347_s5, %s1209_s10 }
 0x27b   : > { %s479_s7 = sshll.u32 %s313_s29, 4  ;;  %s320_s13 = scalar_lea.vmem [#allocation10], %s1187_s20  ;;  %s1251_s7 = int_to_ptr.vmem [resolvable:$true] %s479_s7 }
 0x27c   : > { %s1256_s17 = sshll.u32 %s320_s13, 4  ;;  %s1259_s27 = scalar_lea.sflag [#allocation9], %s445_s28  ;;  %s1290_s17 = int_to_ptr.vmem [resolvable:$true] %s1256_s17 }
 0x27d   : > { %s870_s9 = scalar_lea.vmem %s1251_s7, 128  ;;  %s1000_s19 = smov [#allocation8]  }
 0x27e   : > { %p871_p11 = scmp.ne.s32.totalorder %s1251_s7, %s870_s9  ;;  %s874_s24 = sshll.u32 %s1000_s19, 4  ;;  %s875_s24 = int_to_ptr.vmem [resolvable:$false] %s874_s24 }
 0x27f   : > { %s876_s15 = scalar_lea.vmem %s875_s24, 256  ;;  %p877_p9 = scmp.lt.s32.totalorder %s1251_s7, %s875_s24 }
 0x280   : > { %p872_p0 = pnand %p871_p11, %p1131_p10  ;;  %p878_p1 = scmp.lt.s32.totalorder %s876_s15, %s870_s9 }
 0x282   : > { %p873_p5 = pneg %p872_p0  ;;  %p879_p2 = por %p878_p1, %p877_p9 }
 0x284   : > { %p880_p7 = pnand %p879_p2, %p873_p5 }
 0x2dd   : > { %v433_v26 = vpop.permute.xlu1 %432 }
 0x2de   : > { %435 = vst.msk [vmem:[%s313_s29] sm:$0xff] %vm324_vm0, %v433_v26 }
 0x2df   : > { %883 = shalt.err (!%p880_p7)
}
 0x2e0   : > { %s884_s8 = scalar_lea.hbm %s1249_s14, 128  ;;  %s888_s3 = scalar_lea.hbm %s1347_s5, 256 }
 0x2e1   : > { %p885_p3 = scmp.ne.s32.totalorder %s1249_s14, %s884_s8  ;;  %p889_p6 = scmp.lt.u32.totalorder %s1249_s14, %s1347_s5 }
 0x2e2   : > { %p890_p8 = scmp.lt.u32.totalorder %s888_s3, %s884_s8  ;;  %p892_p11 = scmp.lt.u32.totalorder %s884_s8, %s1249_s14 }
 0x2e3   : > { %p886_p13 = pnand %p885_p3, %p1131_p10 }
 0x2e4   : > { %p891_p12 = por %p890_p8, %p889_p6 }
 0x2e5   : > { %p887_p4 = pneg %p886_p13 }
 0x2e6   : > { %p893_p0 = por %p892_p11, %p891_p12 }
 0x2e8   : > { %p894_p5 = pnand %p893_p0, %p887_p4 }
 0x2ea   : > { %897 = shalt.err (!%p894_p5)
}
 0x2eb   : > { %699 = dma.vmem_to_hbm [thread:$0]  (%p1131_p10), %s1251_s7, 128, %s1249_s14, %s1259_s27  }
 0x2ec   : > { %s1287_s15 = scalar_lea.hbm %s1348_s6, %s1209_s10  ;;  %v437_v27 = vpop.permute.xlu1 %436  ;;  %s898_s8 = scalar_lea.vmem %s1290_s17, 128 }
 0x2ed   : > { %439 = vst.msk [vmem:[%s320_s13] sm:$0xff] %vm324_vm0, %v437_v27  ;;  %p899_p9 = scmp.ne.s32.totalorder %s1290_s17, %s898_s8  ;;  %s1001_s7 = smov [#allocation10]  }
 0x2ee   : > { %s902_s14 = sshll.u32 %s1001_s7, 4  ;;  %s903_s14 = int_to_ptr.vmem [resolvable:$false] %s902_s14 }
 0x2ef   : > { %p900_p1 = pnand %p899_p9, %p1131_p10  ;;  %s904_s28 = scalar_lea.vmem %s903_s14, 256 }
 0x2f0   : > { %p905_p7 = scmp.lt.s32.totalorder %s1290_s17, %s903_s14  ;;  %p906_p3 = scmp.lt.s32.totalorder %s904_s28, %s898_s8 }
 0x2f1   : > { %p901_p2 = pneg %p900_p1 }
 0x2f2   : > { %p907_p13 = por %p906_p3, %p905_p7 }
 0x2f4   : > { %p908_p4 = pnand %p907_p13, %p901_p2 }
 0x2f6   : > { %911 = shalt.err (!%p908_p4)
}
 0x2f7   : > { %s912_s20 = scalar_lea.hbm %s1287_s15, 128  ;;  %s916_s29 = scalar_lea.hbm %s1348_s6, 256 }
 0x2f8   : > { %p913_p6 = scmp.ne.s32.totalorder %s1287_s15, %s912_s20  ;;  %p917_p11 = scmp.lt.u32.totalorder %s1287_s15, %s1348_s6 }
 0x2f9   : > { %p918_p0 = scmp.lt.u32.totalorder %s916_s29, %s912_s20  ;;  %p920_p9 = scmp.lt.u32.totalorder %s912_s20, %s1287_s15 }
 0x2fa   : > { %p914_p8 = pnand %p913_p6, %p1131_p10 }
 0x2fb   : > { %p919_p5 = por %p918_p0, %p917_p11 }
 0x2fc   : > { %p915_p12 = pneg %p914_p8 }
 0x2fd   : > { %p921_p1 = por %p920_p9, %p919_p5 }
 0x2ff   : > { %p922_p2 = pnand %p921_p1, %p915_p12 }
 0x301   : > { %925 = shalt.err (!%p922_p2)
}
 0x302   : > { %700 = dma.vmem_to_hbm [thread:$0]  (%p1131_p10), %s1290_s17, 128, %s1287_s15, %s1259_s27  }
 0x303 PF: > { %s505_s19 = sand.u32 1, %s968_s21   ;;  %p1367_p7 = scmp.ne.s32.totalorder %s1355_s30, 0 }
 0x304   : > { %p1368_p3 = scmp.ge.s32.totalorder %s988_s26, 2  ;;  %s506_s9 = scalar_lea.sflag [#allocation4], %s505_s19 }
 0x306   : > { %p713_p13 = pnand %p1368_p3, %p1367_p7 }
 0x308   : > { %959 = dma.done.wait (!%p713_p13), %s506_s9, 128  }
 0x309   : > { %961 = vsyncadd (!%p713_p13), %s506_s9, 4294967168  ;;  %s1369_s24 = sadd.s32 4294967294, %s988_s26  }
 0x30a   : > { %s514_s8 = sand.u32 1, %s1369_s24  }
 0x30b   : > { %s515_s7 = scalar_lea.sflag [#allocation9], %s514_s8 }
 0x30c   : > { %963 = dma.done.wait (!%p713_p13), %s515_s7, 256  }
 0x30d   : > { %965 = vsyncadd (!%p713_p13), %s515_s7, 4294967040  ;;  %s27_s26 = sadd.s32 1, %s988_s26   ;;  %s1370_s21 = smov %s972_s22 }
 0x30e   : > { %p24_p10 = scmp.ge.s32.totalorder %s27_s26, 4   ;;  %s1371_s22 = smov %s976_s23 }
 0x30f   : > { %s1372_s23 = smov %s1140_s18  ;;  %s1373_s24 = smov %s984_s25 }
 0x310   : > { %s1374_s25 = smov %s1376_s11  ;;  %26 = sbr.rel (!%p24_p10) target bundleno = 11 (0xb), region = 117 }
 0x317   :  { %529 = vsyncpa [#allocation3], 1 }
 0x318   :  { %531 = vsyncpa [#allocation3 + $0x1], 1 }
 0x319   :  { %532 = vsyncpa [#allocation6], 1 }
 0x31a   :  { %533 = vsyncpa [#allocation4], 1 }
 0x31b   :  { %535 = vsyncpa [#allocation4 + $0x1], 1 }
 0x31c   :  { %536 = vsyncpa [#allocation9], 1 }
 0x31d   :  { %538 = vsyncpa [#allocation9 + $0x1], 1 }

</bundles_post_ra>
